<compile_context>
chip_gen: v7x
topology: tpu7x:2x2x1
jax: 0.10.0
libtpu: 0.0.40
codegen_flags: <defaults>
</compile_context>

<pallas_src>
import jax
import jax.numpy as jnp
from jax.experimental import pallas as pl
from jax.experimental.pallas import tpu as pltpu

_TM_MAX = 2048                         # row-tile cap
_VMEM_TILE_BUDGET = 24 * 1024 * 1024   # budget for tiles + resident params
_VMEM_LIMIT_BYTES = 32 * 1024 * 1024   # > v5e 16 MiB default, < v7x 64 MiB physical


def _round_up(x, m):
    return ((x + m - 1) // m) * m


def _sublane(dtype):
    # 8 sublanes for 32-bit, 16 for 16-bit, 32 for 8-bit dtypes.
    return 32 // jnp.dtype(dtype).itemsize


def _linear_kernel(x_ref, w_ref, b_ref, o_ref):
    # (TM, E) @ (E, T) on the MXU with f32 accumulation; bias add in f32.
    # W^T / bias blocks are grid-resident (same block every step).
    acc = jnp.dot(x_ref[...], w_ref[...], preferred_element_type=jnp.float32)
    o_ref[...] = (acc + b_ref[...].astype(jnp.float32)).astype(o_ref.dtype)


def prepare_linear_params(weight, bias, param_dtype=None):
    """One-time (model-load) prep: transpose W, optionally cast (e.g. bf16).

    weight: (num_tasks, emb_dim), bias: (num_tasks,)
    Returns w_t: (emb_dim, num_tasks), b_row: (1, num_tasks) f32.
    """
    w_t = jnp.asarray(weight).T
    if param_dtype is not None:
        w_t = w_t.astype(param_dtype)
    b_row = jnp.asarray(bias, jnp.float32).reshape(1, -1)
    return w_t, b_row


@jax.jit
def linear_predictor_apply(x, w_t, b_row):
    """Hot path: x (N, emb_dim) -> (N, num_tasks).  No padding, no slicing."""
    n, emb_dim = x.shape
    num_tasks = w_t.shape[1]

    in_isize = jnp.dtype(x.dtype).itemsize
    w_isize = jnp.dtype(w_t.dtype).itemsize
    out_isize = in_isize  # output in x.dtype

    # Row tile from a VMEM budget: double-buffered x + out tiles, plus the
    # resident W^T / bias.  Rounded to the dtype's sublane tile, capped at 2048.
    sub = _sublane(x.dtype)
    per_row_bytes = 2 * emb_dim * in_isize + 2 * num_tasks * out_isize
    resident_bytes = emb_dim * num_tasks * w_isize + num_tasks * 4
    tm_budget = max(sub, (_VMEM_TILE_BUDGET - resident_bytes) // per_row_bytes)
    tm_cap = max(sub, min(_TM_MAX, (tm_budget // sub) * sub))
    # If the whole batch fits in one tile, use the full (unrounded) extent:
    # a block equal to the full array dim is always layout-legal.
    tm = n if n <= tm_cap else tm_cap

    grid = (pl.cdiv(n, tm),)

    cost = pl.CostEstimate(
        flops=2 * n * emb_dim * num_tasks,
        bytes_accessed=(n * emb_dim * in_isize
                        + emb_dim * num_tasks * w_isize
                        + n * num_tasks * out_isize),
        transcendentals=0,
    )

    return pl.pallas_call(
        _linear_kernel,
        out_shape=jax.ShapeDtypeStruct((n, num_tasks), x.dtype),
        grid=grid,
        in_specs=[
            # x streams through the pipeline, one row-tile per grid step.
            pl.BlockSpec((tm, emb_dim), lambda i: (i, 0)),
            # W^T and bias stay resident across all grid steps.
            pl.BlockSpec((emb_dim, num_tasks), lambda i: (0, 0)),
            pl.BlockSpec((1, num_tasks), lambda i: (0, 0)),
        ],
        out_specs=pl.BlockSpec((tm, num_tasks), lambda i: (i, 0)),
        compiler_params=pltpu.CompilerParams(
            dimension_semantics=("parallel",),
            vmem_limit_bytes=_VMEM_LIMIT_BYTES,
        ),
        cost_estimate=cost,
    )(x, w_t, b_row)


def linear_predictor_forward(x, weight, bias):
    """Convenience wrapper matching forward(x).  NOTE: re-preps the weights
    every call -- for real use, call prepare_linear_params once at model load
    and then linear_predictor_apply directly."""
    w_t, b_row = prepare_linear_params(weight, bias)
    return linear_predictor_apply(x, w_t, b_row)


if __name__ == "__main__":
    emb_dim = 32
    num_tasks = 8
    batch = 8

    key = jax.random.PRNGKey(0)
    kx, kw, kb = jax.random.split(key, 3)

    # Deterministic init mimicking nn.Linear's uniform(-1/sqrt(fan_in), +1/sqrt(fan_in))
    bound = 1.0 / (emb_dim ** 0.5)
    weight = jax.random.uniform(kw, (num_tasks, emb_dim), jnp.float32, -bound, bound)
    bias = jax.random.uniform(kb, (num_tasks,), jnp.float32, -bound, bound)
    x = jax.random.normal(kx, (batch, emb_dim), jnp.float32)

    ref = x @ weight.T + bias

    # --- f32 path (params prepared once, then the cached apply is called) ---
    w_t_f32, b_row = prepare_linear_params(weight, bias)
    out_f32 = jax.block_until_ready(linear_predictor_apply(x, w_t_f32, b_row))
    assert out_f32.shape == (batch, num_tasks), out_f32.shape
    assert jnp.allclose(out_f32, ref, atol=1e-5, rtol=1e-5)

    # --- bf16 path (halved x-read HBM traffic when activations are bf16) ---
    w_t_bf16, b_row2 = prepare_linear_params(weight, bias, param_dtype=jnp.bfloat16)
    x_bf16 = x.astype(jnp.bfloat16)
    out_bf16 = jax.block_until_ready(linear_predictor_apply(x_bf16, w_t_bf16, b_row2))
    assert out_bf16.shape == (batch, num_tasks), out_bf16.shape
    assert jnp.allclose(out_bf16.astype(jnp.float32), ref, atol=5e-2, rtol=5e-2)

    print("KERNEL_OK")
</pallas_src>

<mosaic_0001>
module attributes {stable_mosaic.version = 11 : i64} {
  func.func @_linear_kernel(%arg0: i32, %arg1: memref<8x32xf32, #tpu.memory_space<vmem>>, %arg2: memref<32x8xf32, #tpu.memory_space<vmem>>, %arg3: memref<1x8xf32, #tpu.memory_space<vmem>>, %arg4: memref<8x8xf32, #tpu.memory_space<vmem>>) attributes {dimension_semantics = [#tpu.dimension_semantics<parallel>], iteration_bounds = array<i64: 1>, scalar_prefetch = 0 : i64, scratch_operands = 0 : i64, tpu.core_type = #tpu.core_type<tc>, window_params = [{transform_indices = @transform_0, window_bounds = array<i64: 8, 32>}, {pipeline_mode = #tpu.pipeline_mode<synchronous>, transform_indices = @transform_1, window_bounds = array<i64: 32, 8>}, {pipeline_mode = #tpu.pipeline_mode<synchronous>, transform_indices = @transform_2, window_bounds = array<i64: 1, 8>}, {transform_indices = @transform_3, window_bounds = array<i64: 8, 8>}]} {
    %c0 = arith.constant 0 : index
    %c0_0 = arith.constant 0 : index
    %0 = vector.load %arg1[%c0, %c0_0] : memref<8x32xf32, #tpu.memory_space<vmem>>, vector<8x32xf32>
    %c0_1 = arith.constant 0 : index
    %c0_2 = arith.constant 0 : index
    %1 = vector.load %arg2[%c0_1, %c0_2] : memref<32x8xf32, #tpu.memory_space<vmem>>, vector<32x8xf32>
    %cst = arith.constant dense<0.000000e+00> : vector<8x8xf32>
    %2 = tpu.matmul %0, %1, %cst {dimension_numbers = #tpu.dot_dimension_numbers<[1], [0], [0], [1], [0, 0, 1, 1], [], []>} : vector<8x32xf32>, vector<32x8xf32>, vector<8x8xf32> -> vector<8x8xf32>
    %c0_3 = arith.constant 0 : index
    %c0_4 = arith.constant 0 : index
    %3 = vector.load %arg3[%c0_3, %c0_4] : memref<1x8xf32, #tpu.memory_space<vmem>>, vector<1x8xf32>
    %4 = vector.broadcast %3 : vector<1x8xf32> to vector<8x8xf32>
    %5 = arith.addf %2, %4 : vector<8x8xf32>
    %c0_5 = arith.constant 0 : index
    %c0_6 = arith.constant 0 : index
    %6 = vector.load %arg4[%c0_5, %c0_6] : memref<8x8xf32, #tpu.memory_space<vmem>>, vector<8x8xf32>
    tpu.vector_store %arg4[%c0_5, %c0_6], %5 {strides = array<i32>} : memref<8x8xf32, #tpu.memory_space<vmem>>, vector<8x8xf32>,
    return
  }
  func.func @transform_0(%arg0: i32) -> (i32, i32) {
    %c0_i32 = arith.constant 0 : i32
    %c0_i32_0 = arith.constant 0 : i32
    return %arg0, %c0_i32 : i32, i32
  }
  func.func @transform_1(%arg0: i32) -> (i32, i32) {
    %c0_i32 = arith.constant 0 : i32
    %c0_i32_0 = arith.constant 0 : i32
    %c0_i32_1 = arith.constant 0 : i32
    return %c0_i32, %c0_i32_0 : i32, i32
  }
  func.func @transform_2(%arg0: i32) -> (i32, i32) {
    %c0_i32 = arith.constant 0 : i32
    %c0_i32_0 = arith.constant 0 : i32
    %c0_i32_1 = arith.constant 0 : i32
    return %c0_i32, %c0_i32_0 : i32, i32
  }
  func.func @transform_3(%arg0: i32) -> (i32, i32) {
    %c0_i32 = arith.constant 0 : i32
    %c0_i32_0 = arith.constant 0 : i32
    return %arg0, %c0_i32 : i32, i32
  }
}

</mosaic_0001>

<bundles_post_ra>
// kernel: linear_predictor_apply.1
= control target key start
LH: loop header
LB: loop body
LE: loop exit
PB: predicated region body
PF: predicated region fallthrough
CT: control target
= control target key end

     0   :  { %v169_v3 = vmov 0.0|0.0   ;;  %vm170_vm0 = vmmov 0   ;;  %v171_v6 = vmov 0.0   ;;  %s223_s0 = inlined_call_operand.vmem [shape: f32[8,32], index: 0, kind: input, shape index: {}]   ;;  %s224_s1 = inlined_call_operand.vmem [shape: f32[32,8], index: 1, kind: input, shape index: {}]   ;;  %s225_s2 = inlined_call_operand.vmem [shape: f32[1,8], index: 2, kind: input, shape index: {}]   ;;  %s226_s3 = inlined_call_operand.hbm [shape: f32[8,8], index: 3, kind: output, shape index: {}]  }
   0x1   :  { %v16_v0 = vld [vmem:[%s224_s1] sm:$0xff]  ;;  %v17_v1 = vld [vmem:[%s224_s1 + $0x8] sm:$0xff]  ;;  %v18_v2 = vld [vmem:[%s224_s1 + $0x10] sm:$0xff]  ;;  %135 = vmatprep.subr.bf16.mxu0 %v169_v3  ;;  %132 = vmatprep.mubr.msk.f32.mxu0 %vm170_vm0, %v171_v6 }
   0x2   :  { %v136_v4 = vpack.c.bf16 %v17_v1, %v16_v0  ;;  %v19_v5 = vld [vmem:[%s224_s1 + $0x18] sm:$0xff] }
   0x3   :  { %8 = vsyncpa [#allocation3], 0  ;;  %v139_v7 = vpack.c.bf16 %v19_v5, %v18_v2  ;;  %v15_v8 = vld [vmem:[%s223_s0] sm:$0xff]  ;;  %vm27_vm1 = vcmask 261120   ;;  %s172_s24 = smov [#allocation2]   ;;  %vm101_vm2 = vcmask 64512  }
   0x4   :  { %137 = vmatpush3.bf16.msra.mxu0 %v136_v4  ;;  %v117_v9 = vld [vmem:[%s225_s2] ss:$0 sm:$0xff]  ;;  %s109_s1 = sshll.u32 %s172_s24, 4  ;;  %s110_s1 = int_to_ptr.vmem [resolvable:$true] %s109_s1 }
   0x5   :  { %138 = vmatprep.subr.bf16.mxu0 %v169_v3  ;;  %s145_s25 = scalar_lea.vmem %s110_s1, 128  ;;  %p150_p1 = scmp.lt.s32.totalorder %s110_s1, %s110_s1 }
   0x6   :  { %p146_p0 = scmp.ne.s32.totalorder %s110_s1, %s145_s25  ;;  %p151_p2 = scmp.lt.s32.totalorder %s145_s25, %s145_s25 }
   0x8   :  { %140 = vmatpush3.bf16.msra.mxu0 %v139_v7  ;;  %p152_p3 = por %p151_p2, %p150_p1 }
   0xa   :  { %p153_p4 = pnand %p152_p3, %p146_p0 }
   0xb   :  { %133 = vmatmul.mubr.msk.f32.vlgmr.msra.gmra.mrb[0].mxu0 %vm27_vm1, %v15_v8 }
  0xde   :  { %v97_v10 = vpop.f32.mrb[0].mxu0 }
  0xdf   :  { %v98_v11 = vadd.f32 %v117_v9, %v97_v10  ;;  %v134_v12 = vpop.f32.mrb[1].mxu0 }
  0xe1   :  { %102 = vst.msk [vmem:[#allocation2] sm:$0xff] %vm101_vm2, %v98_v11 }
  0xe2   :  { %156 = shalt.err (!%p153_p4)
}
  0xe3   :  { %s157_s27 = scalar_lea.hbm %s226_s3, 128 }
  0xe4   :  { %p158_p5 = scmp.ne.s32.totalorder %s226_s3, %s157_s27  ;;  %p161_p6 = scmp.lt.u32.totalorder %s157_s27, %s226_s3 }
  0xe6   :  { %p163_p7 = pnand %p161_p6, %p158_p5 }
  0xe8   :  { %166 = shalt.err (!%p163_p7)
}
  0xe9   :  { %112 = dma.vmem_to_hbm [thread:$0]  %s110_s1, 128, %s226_s3, [#allocation3]  }
  0xea   :  { %167 = dma.done.wait [#allocation3], 128  }
  0xeb   :  { %168 = vsyncadd [#allocation3], 4294967168 }
  0xec   :  { %116 = vsyncpa [#allocation3], 1 }

</bundles_post_ra>
